<compile_context>
chip_gen: v5e
topology: v5e:2x2
jax: 0.10.0
libtpu: 0.0.40
codegen_flags: <defaults>
</compile_context>

<pallas_src>
import math
from functools import partial

import jax
import jax.numpy as jnp
from jax.experimental import pallas as pl
from jax.experimental.pallas import tpu as pltpu


# --------------------------------------------------------------------------
# helpers
# --------------------------------------------------------------------------
def _ceil_to(x, m):
    return ((x + m - 1) // m) * m


def _largest_tile(dim, limit, quantum):
    """Largest multiple of `quantum` that divides `dim` and is <= limit."""
    t = min(limit, dim)
    t -= t % quantum
    while t > quantum:
        if dim % t == 0:
            return t
        t -= quantum
    return quantum


# --------------------------------------------------------------------------
# Tiled MXU matmul kernels (conv / FC hot path) - bf16 inputs, f32 accumulate
# --------------------------------------------------------------------------
def _matmul_kernel(a_ref, b_ref, o_ref, acc_ref):
    @pl.when(pl.program_id(2) == 0)
    def _():
        acc_ref[...] = jnp.zeros_like(acc_ref)

    acc_ref[...] += jnp.dot(a_ref[...], b_ref[...],
                            preferred_element_type=jnp.float32)

    @pl.when(pl.program_id(2) == pl.num_programs(2) - 1)
    def _():
        o_ref[...] = acc_ref[...].astype(o_ref.dtype)


def _matmul_bias_kernel(a_ref, b_ref, bias_ref, o_ref, acc_ref):
    @pl.when(pl.program_id(2) == 0)
    def _():
        acc_ref[...] = jnp.zeros_like(acc_ref)

    acc_ref[...] += jnp.dot(a_ref[...], b_ref[...],
                            preferred_element_type=jnp.float32)

    @pl.when(pl.program_id(2) == pl.num_programs(2) - 1)
    def _():
        o_ref[...] = (acc_ref[...] + bias_ref[...]).astype(o_ref.dtype)


def pallas_matmul(a, b, bias=None, out_dtype=jnp.bfloat16):
    """a: [M, K] (cast to bf16), b: [K, N] bf16 (pre-padded), bias: [1, N] f32."""
    M, K = a.shape
    Kb, N = b.shape
    assert K == Kb, (K, Kb)
    a = a.astype(jnp.bfloat16)

    M8 = _ceil_to(M, 8)
    if M8 != M:                       # only tiny tensors (deep layers) hit this
        a = jnp.pad(a, ((0, M8 - M), (0, 0)))

    TM = _largest_tile(M8, 256, 8)
    TN = N if N <= 512 else _largest_tile(N, 512, 128)
    TK = K if K < 128 else _largest_tile(K, 512, 128)
    assert M8 % TM == 0 and N % TN == 0 and K % TK == 0, (M8, N, K, TM, TN, TK)

    grid = (M8 // TM, N // TN, K // TK)
    a_spec = pl.BlockSpec((TM, TK), lambda i, j, k: (i, k))
    b_spec = pl.BlockSpec((TK, TN), lambda i, j, k: (k, j))
    o_spec = pl.BlockSpec((TM, TN), lambda i, j, k: (i, j))
    cp = pltpu.CompilerParams(
        dimension_semantics=("parallel", "parallel", "arbitrary"))

    if bias is None:
        out = pl.pallas_call(
            _matmul_kernel,
            out_shape=jax.ShapeDtypeStruct((M8, N), out_dtype),
            grid=grid,
            in_specs=[a_spec, b_spec],
            out_specs=o_spec,
            scratch_shapes=[pltpu.VMEM((TM, TN), jnp.float32)],
            compiler_params=cp,
        )(a, b)
    else:
        out = pl.pallas_call(
            _matmul_bias_kernel,
            out_shape=jax.ShapeDtypeStruct((M8, N), out_dtype),
            grid=grid,
            in_specs=[a_spec, b_spec,
                      pl.BlockSpec((1, TN), lambda i, j, k: (0, j))],
            out_specs=o_spec,
            scratch_shapes=[pltpu.VMEM((TM, TN), jnp.float32)],
            compiler_params=cp,
        )(a, b, bias)

    return out[:M] if M8 != M else out


# --------------------------------------------------------------------------
# Conv2d = (1x1: direct GEMM) / (kxk: bf16 im2col with fused K-pad) + matmul
# --------------------------------------------------------------------------
@partial(jax.jit, static_argnums=(2, 3, 4, 5))
def _conv2d_impl(x, wmat, kh, kw, stride, padding):
    N, H, W, Cin = x.shape
    Kp, Cout = wmat.shape
    Ho = (H + 2 * padding - kh) // stride + 1
    Wo = (W + 2 * padding - kw) // stride + 1
    x = x.astype(jnp.bfloat16)

    if kh == 1 and kw == 1:
        if stride != 1:
            x = x[:, ::stride, ::stride, :]
        a = x.reshape(N * Ho * Wo, Cin)
    else:
        xp = jnp.pad(x, ((0, 0), (padding, padding), (padding, padding), (0, 0)))
        taps = [xp[:, i:i + stride * (Ho - 1) + 1:stride,
                   j:j + stride * (Wo - 1) + 1:stride, :]
                for i in range(kh) for j in range(kw)]
        K = kh * kw * Cin
        if Kp > K:  # fuse the K-padding into the single im2col concat
            taps.append(jnp.zeros((N, Ho, Wo, Kp - K), jnp.bfloat16))
        a = jnp.concatenate(taps, axis=-1).reshape(N * Ho * Wo, Kp)

    out = pallas_matmul(a, wmat)                       # bf16 output
    return out.reshape(N, Ho, Wo, Cout)


def conv2d(x, wmat, kh, kw, stride=1, padding=0):
    return _conv2d_impl(x, wmat, kh, kw, stride, padding)


# --------------------------------------------------------------------------
# BatchNorm (batch statistics) + optional fused residual add + ReLU
# --------------------------------------------------------------------------
def _bn_stats_kernel(x_ref, g_ref, b_ref, scale_ref, shift_ref,
                     sum_sc, sq_sc, *, inv_n, eps):
    @pl.when(pl.program_id(0) == 0)
    def _():
        sum_sc[...] = jnp.zeros_like(sum_sc)
        sq_sc[...] = jnp.zeros_like(sq_sc)

    x = x_ref[...].astype(jnp.float32)
    sum_sc[...] += jnp.sum(x, axis=0, keepdims=True)
    sq_sc[...] += jnp.sum(x * x, axis=0, keepdims=True)

    @pl.when(pl.program_id(0) == pl.num_programs(0) - 1)
    def _():
        mean = sum_sc[...] * inv_n
        var = jnp.maximum(sq_sc[...] * inv_n - mean * mean, 0.0)
        scale = g_ref[...] * jax.lax.rsqrt(var + eps)
        scale_ref[...] = scale
        shift_ref[...] = b_ref[...] - mean * scale


def _bn_apply_kernel(x_ref, scale_ref, shift_ref, o_ref, *, relu):
    y = x_ref[...].astype(jnp.float32) * scale_ref[...] + shift_ref[...]
    if relu:
        y = jnp.maximum(y, 0.0)
    o_ref[...] = y.astype(o_ref.dtype)


def _bn_add_relu_kernel(x_ref, idn_ref, scale_ref, shift_ref, o_ref):
    y = (x_ref[...].astype(jnp.float32) * scale_ref[...] + shift_ref[...]
         + idn_ref[...].astype(jnp.float32))
    o_ref[...] = jnp.maximum(y, 0.0).astype(o_ref.dtype)


@partial(jax.jit, static_argnums=(3,))
def _batchnorm_impl(x, gamma, beta, relu, idn):
    N, H, W, C = x.shape
    R = N * H * W
    x2 = x.reshape(R, C)
    idn2 = idn.reshape(R, C) if idn is not None else None

    R8 = _ceil_to(R, 8)
    if R8 != R:  # zero rows do not perturb the (true-count) batch statistics
        x2 = jnp.pad(x2, ((0, R8 - R), (0, 0)))
        if idn2 is not None:
            idn2 = jnp.pad(idn2, ((0, R8 - R), (0, 0)))

    RT = _largest_tile(R8, 512, 8)
    g = gamma.reshape(1, C).astype(jnp.float32)
    b = beta.reshape(1, C).astype(jnp.float32)

    row_spec = pl.BlockSpec((RT, C), lambda r: (r, 0))
    vec_spec = pl.BlockSpec((1, C), lambda r: (0, 0))

    scale, shift = pl.pallas_call(
        partial(_bn_stats_kernel, inv_n=1.0 / R, eps=1e-5),
        out_shape=(jax.ShapeDtypeStruct((1, C), jnp.float32),
                   jax.ShapeDtypeStruct((1, C), jnp.float32)),
        grid=(R8 // RT,),
        in_specs=[row_spec, vec_spec, vec_spec],
        out_specs=(vec_spec, vec_spec),
        scratch_shapes=[pltpu.VMEM((1, C), jnp.float32),
                        pltpu.VMEM((1, C), jnp.float32)],
        compiler_params=pltpu.CompilerParams(
            dimension_semantics=("arbitrary",)),
    )(x2, g, b)

    if idn2 is None:
        y = pl.pallas_call(
            partial(_bn_apply_kernel, relu=relu),
            out_shape=jax.ShapeDtypeStruct((R8, C), jnp.bfloat16),
            grid=(R8 // RT,),
            in_specs=[row_spec, vec_spec, vec_spec],
            out_specs=row_spec,
            compiler_params=pltpu.CompilerParams(
                dimension_semantics=("parallel",)),
        )(x2, scale, shift)
    else:
        y = pl.pallas_call(
            _bn_add_relu_kernel,
            out_shape=jax.ShapeDtypeStruct((R8, C), jnp.bfloat16),
            grid=(R8 // RT,),
            in_specs=[row_spec, row_spec, vec_spec, vec_spec],
            out_specs=row_spec,
            compiler_params=pltpu.CompilerParams(
                dimension_semantics=("parallel",)),
        )(x2, idn2, scale, shift)

    if R8 != R:
        y = y[:R]
    return y.reshape(N, H, W, C)


def batchnorm(x, gamma, beta, relu=True, idn=None):
    return _batchnorm_impl(x, gamma, beta, relu, idn)


# --------------------------------------------------------------------------
# MaxPool 3x3 / stride 2 / pad 1
# --------------------------------------------------------------------------
@jax.jit
def _maxpool3x3s2(x):
    # TODO(synk): max-pool is left to XLA as a fused chained-max over the 9
    # strided views (single read/write pass), per review option (a); a Pallas
    # version would need overlapping/stride-2 window handling for no gain.
    N, H, W, C = x.shape
    Ho = (H + 2 - 3) // 2 + 1
    Wo = (W + 2 - 3) // 2 + 1
    xp = jnp.pad(x, ((0, 0), (1, 1), (1, 1), (0, 0)),
                 constant_values=-jnp.inf)
    m = None
    for i in range(3):
        for j in range(3):
            t = xp[:, i:i + 2 * (Ho - 1) + 1:2, j:j + 2 * (Wo - 1) + 1:2, :]
            m = t if m is None else jnp.maximum(m, t)
    return m


# --------------------------------------------------------------------------
# Global average pool + FC head (bias folded into the matmul epilogue)
# --------------------------------------------------------------------------
def _avgpool_kernel(x_ref, o_ref):
    hw = x_ref.shape[1]
    s = jnp.sum(x_ref[...].astype(jnp.float32), axis=1, keepdims=True)
    o_ref[...] = (s * (1.0 / hw)).astype(o_ref.dtype)


@jax.jit
def _head_impl(x, fc_w, fc_b):
    N, H, W, C = x.shape
    x3 = x.reshape(N, H * W, C)
    pooled = pl.pallas_call(
        _avgpool_kernel,
        out_shape=jax.ShapeDtypeStruct((N, 1, C), jnp.bfloat16),
        grid=(N,),
        in_specs=[pl.BlockSpec((1, H * W, C), lambda n: (n, 0, 0))],
        out_specs=pl.BlockSpec((1, 1, C), lambda n: (n, 0, 0)),
        compiler_params=pltpu.CompilerParams(
            dimension_semantics=("parallel",)),
    )(x3)[:, 0, :]
    return pallas_matmul(pooled, fc_w, bias=fc_b, out_dtype=jnp.float32)


# --------------------------------------------------------------------------
# ResNet-50 forward (Bottleneck blocks, torchvision topology)
# --------------------------------------------------------------------------
def bottleneck(x, p):
    s = p['stride']
    out = conv2d(x, p['conv1_w'], 1, 1, 1, 0)
    out = batchnorm(out, p['bn1_g'], p['bn1_b'], relu=True)
    out = conv2d(out, p['conv2_w'], 3, 3, s, 1)
    out = batchnorm(out, p['bn2_g'], p['bn2_b'], relu=True)
    out = conv2d(out, p['conv3_w'], 1, 1, 1, 0)
    if 'down_w' in p:
        idn = conv2d(x, p['down_w'], 1, 1, s, 0)
        idn = batchnorm(idn, p['down_g'], p['down_b'], relu=False)
    else:
        idn = x
    # fused bn3 + residual add + ReLU (single Pallas pass)
    return batchnorm(out, p['bn3_g'], p['bn3_b'], relu=True, idn=idn)


def resnet50_forward(x_nchw, pp):
    x = jnp.transpose(x_nchw, (0, 2, 3, 1))            # NCHW -> NHWC
    x = conv2d(x, pp['conv1_w'], 7, 7, 2, 3)
    x = batchnorm(x, pp['bn1_g'], pp['bn1_b'], relu=True)
    x = _maxpool3x3s2(x)
    for name in ('layer1', 'layer2', 'layer3', 'layer4'):
        for blk in pp[name]:
            x = bottleneck(x, blk)
    return _head_impl(x, pp['fc_w'], pp['fc_b'])       # [N, num_classes] f32


# --------------------------------------------------------------------------
# Deterministic parameter construction (shapes = torchvision resnet50,
# fc replaced with Linear(2048, number_of_classes))
# --------------------------------------------------------------------------
def make_params(seed=0, num_classes=10):
    key = jax.random.PRNGKey(seed)
    counter = [0]

    def nk():
        counter[0] += 1
        return jax.random.fold_in(key, counter[0])

    def conv_w(cout, cin, kh, kw):
        fan_in = cin * kh * kw
        return (jax.random.normal(nk(), (cout, cin, kh, kw), jnp.float32)
                * math.sqrt(2.0 / fan_in))

    def bn_p(c):
        g = 1.0 + 0.05 * jax.random.normal(nk(), (c,), jnp.float32)
        b = 0.05 * jax.random.normal(nk(), (c,), jnp.float32)
        return g, b

    params = {'conv1_w': conv_w(64, 3, 7, 7)}
    params['bn1_g'], params['bn1_b'] = bn_p(64)

    layer_cfg = [('layer1', 64, 3, 1), ('layer2', 128, 4, 2),
                 ('layer3', 256, 6, 2), ('layer4', 512, 3, 2)]
    inplanes = 64
    for name, planes, nblocks, stride in layer_cfg:
        blocks = []
        for bidx in range(nblocks):
            s = stride if bidx == 0 else 1
            blk = {'stride': s,
                   'conv1_w': conv_w(planes, inplanes, 1, 1)}
            blk['bn1_g'], blk['bn1_b'] = bn_p(planes)
            blk['conv2_w'] = conv_w(planes, planes, 3, 3)
            blk['bn2_g'], blk['bn2_b'] = bn_p(planes)
            blk['conv3_w'] = conv_w(planes * 4, planes, 1, 1)
            blk['bn3_g'], blk['bn3_b'] = bn_p(planes * 4)
            if s != 1 or inplanes != planes * 4:
                blk['down_w'] = conv_w(planes * 4, inplanes, 1, 1)
                blk['down_g'], blk['down_b'] = bn_p(planes * 4)
            blocks.append(blk)
            inplanes = planes * 4
        params[name] = blocks

    params['fc_w'] = (jax.random.normal(nk(), (num_classes, 2048), jnp.float32)
                      / math.sqrt(2048.0))
    params['fc_b'] = 0.01 * jax.random.normal(nk(), (num_classes,), jnp.float32)
    return params


def _prep_conv_w(w_oihw):
    """OIHW weights -> (Kp, Cout) bf16 matmul operand, K padded to 128 once."""
    cout, cin, kh, kw = w_oihw.shape
    k = kh * kw * cin
    kp = k if k < 128 else _ceil_to(k, 128)
    wm = jnp.transpose(w_oihw, (2, 3, 1, 0)).reshape(k, cout)
    if kp != k:
        wm = jnp.pad(wm, ((0, kp - k), (0, 0)))
    return wm.astype(jnp.bfloat16)


def prepare_params(params):
    """One-time weight preparation (hoisted out of the forward path)."""
    pp = {'conv1_w': _prep_conv_w(params['conv1_w']),
          'bn1_g': params['bn1_g'], 'bn1_b': params['bn1_b']}
    for name in ('layer1', 'layer2', 'layer3', 'layer4'):
        blocks = []
        for blk in params[name]:
            nb = {'stride': blk['stride']}
            for c in ('conv1', 'conv2', 'conv3'):
                nb[c + '_w'] = _prep_conv_w(blk[c + '_w'])
            for bn in ('bn1', 'bn2', 'bn3'):
                nb[bn + '_g'] = blk[bn + '_g']
                nb[bn + '_b'] = blk[bn + '_b']
            if 'down_w' in blk:
                nb['down_w'] = _prep_conv_w(blk['down_w'])
                nb['down_g'] = blk['down_g']
                nb['down_b'] = blk['down_b']
            blocks.append(nb)
        pp[name] = blocks
    pp['fc_w'] = jnp.transpose(params['fc_w']).astype(jnp.bfloat16)   # (2048, nc)
    pp['fc_b'] = params['fc_b'].astype(jnp.float32).reshape(1, -1)
    return pp


if __name__ == "__main__":
    params = make_params(seed=0, num_classes=10)
    prepped = prepare_params(params)
    x = jax.random.normal(jax.random.PRNGKey(0), (2, 3, 32, 32), jnp.float32)
    logits = resnet50_forward(x, prepped)
    logits = jax.block_until_ready(logits)
    assert logits.shape == (2, 10), logits.shape
    assert bool(jnp.all(jnp.isfinite(logits)))
    print("KERNEL_OK")
</pallas_src>

<mosaic_0001>
module attributes {stable_mosaic.version = 11 : i64} {
  func.func @_matmul_kernel(%arg0: i32, %arg1: i32, %arg2: i32, %arg3: memref<256x256xbf16, #tpu.memory_space<vmem>>, %arg4: memref<256x64xbf16, #tpu.memory_space<vmem>>, %arg5: memref<256x64xbf16, #tpu.memory_space<vmem>>, %arg6: memref<256x64xf32, #tpu.memory_space<vmem>>) attributes {dimension_semantics = [#tpu.dimension_semantics<parallel>, #tpu.dimension_semantics<parallel>, #tpu.dimension_semantics<arbitrary>], iteration_bounds = array<i64: 2, 1, 1>, scalar_prefetch = 0 : i64, scratch_operands = 1 : i64, tpu.core_type = #tpu.core_type<tc>, window_params = [{transform_indices = @transform_0, window_bounds = array<i64: 256, 256>}, {transform_indices = @transform_1, window_bounds = array<i64: 256, 64>}, {transform_indices = @transform_2, window_bounds = array<i64: 256, 64>}]} {
    %c0_i32 = arith.constant 0 : i32
    %0 = arith.cmpi eq, %arg2, %c0_i32 : i32
    %1 = arith.extui %0 : i1 to i32
    %c0_i32_0 = arith.constant 0 : i32
    %2 = arith.cmpi ne, %1, %c0_i32_0 : i32
    scf.if %2 {
      %cst_10 = arith.constant 0.000000e+00 : f32
      %12 = vector.broadcast %cst_10 : f32 to vector<256x64xf32>
      %c0_11 = arith.constant 0 : index
      %c0_12 = arith.constant 0 : index
      %13 = vector.load %arg6[%c0_11, %c0_12] : memref<256x64xf32, #tpu.memory_space<vmem>>, vector<256x64xf32>
      tpu.vector_store %arg6[%c0_11, %c0_12], %12 {strides = array<i32>} : memref<256x64xf32, #tpu.memory_space<vmem>>, vector<256x64xf32>,
    } else {
    }
    %c0 = arith.constant 0 : index
    %c0_1 = arith.constant 0 : index
    %3 = vector.load %arg6[%c0, %c0_1] : memref<256x64xf32, #tpu.memory_space<vmem>>, vector<256x64xf32>
    %c0_2 = arith.constant 0 : index
    %c0_3 = arith.constant 0 : index
    %4 = vector.load %arg3[%c0_2, %c0_3] : memref<256x256xbf16, #tpu.memory_space<vmem>>, vector<256x256xbf16>
    %c0_4 = arith.constant 0 : index
    %c0_5 = arith.constant 0 : index
    %5 = vector.load %arg4[%c0_4, %c0_5] : memref<256x64xbf16, #tpu.memory_space<vmem>>, vector<256x64xbf16>
    %cst = arith.constant dense<0.000000e+00> : vector<256x64xf32>
    %6 = tpu.matmul %4, %5, %cst {dimension_numbers = #tpu.dot_dimension_numbers<[1], [0], [0], [1], [0, 0, 1, 1], [], []>} : vector<256x256xbf16>, vector<256x64xbf16>, vector<256x64xf32> -> vector<256x64xf32>
    %7 = arith.addf %3, %6 : vector<256x64xf32>
    %c0_6 = arith.constant 0 : index
    %c0_7 = arith.constant 0 : index
    %8 = vector.load %arg6[%c0_6, %c0_7] : memref<256x64xf32, #tpu.memory_space<vmem>>, vector<256x64xf32>
    tpu.vector_store %arg6[%c0_6, %c0_7], %7 {strides = array<i32>} : memref<256x64xf32, #tpu.memory_space<vmem>>, vector<256x64xf32>,
    %c0_i32_8 = arith.constant 0 : i32
    %9 = arith.cmpi eq, %arg2, %c0_i32_8 : i32
    %10 = arith.extui %9 : i1 to i32
    %c0_i32_9 = arith.constant 0 : i32
    %11 = arith.cmpi ne, %10, %c0_i32_9 : i32
    scf.if %11 {
      %c0_10 = arith.constant 0 : index
      %c0_11 = arith.constant 0 : index
      %12 = vector.load %arg6[%c0_10, %c0_11] : memref<256x64xf32, #tpu.memory_space<vmem>>, vector<256x64xf32>
      %13 = arith.truncf %12 : vector<256x64xf32> to vector<256x64xbf16>
      %c0_12 = arith.constant 0 : index
      %c0_13 = arith.constant 0 : index
      %14 = vector.load %arg5[%c0_12, %c0_13] : memref<256x64xbf16, #tpu.memory_space<vmem>>, vector<256x64xbf16>
      tpu.vector_store %arg5[%c0_12, %c0_13], %13 {strides = array<i32>} : memref<256x64xbf16, #tpu.memory_space<vmem>>, vector<256x64xbf16>,
    } else {
    }
    return
  }
  func.func @transform_0(%arg0: i32, %arg1: i32, %arg2: i32) -> (i32, i32) {
    %c0_i32 = arith.constant 0 : i32
    return %arg0, %arg2 : i32, i32
  }
  func.func @transform_1(%arg0: i32, %arg1: i32, %arg2: i32) -> (i32, i32) {
    %c0_i32 = arith.constant 0 : i32
    return %arg2, %arg1 : i32, i32
  }
  func.func @transform_2(%arg0: i32, %arg1: i32, %arg2: i32) -> (i32, i32) {
    %c0_i32 = arith.constant 0 : i32
    return %arg0, %arg1 : i32, i32
  }
}

</mosaic_0001>

<bundles_post_ra>
// kernel: _conv2d_impl.1
= control target key start
LH: loop header
LB: loop body
LE: loop exit
PB: predicated region body
PF: predicated region fallthrough
CT: control target
= control target key end

     0   :  { %7 = vsyncpa [#allocation4], 0  ;;  %s1840_s0 = inlined_call_operand.vmem [shape: bf16[512,256], index: 0, kind: input, shape index: {}]   ;;  %s1841_s1 = inlined_call_operand.vmem [shape: bf16[256,64], index: 1, kind: input, shape index: {}]   ;;  %s1842_s2 = inlined_call_operand.hbm [shape: bf16[512,64], index: 2, kind: output, shape index: {}]  }
   0x1   :  { %9 = vsyncpa [#allocation4 + $0x1], 0  ;;  %s1495_s9 = smov 0   ;;  %s1497_s10 = smov 0  }
   0x2   :  { %s1499_s11 = smov 0   ;;  %s1501_s12 = smov 0  }
   0x3   :  { %s1503_s13 = smov 0   ;;  %s1505_s14 = smov 0  }
   0x4 LB: > { %s1066_s15 = sadd.s32 4294967295, %s1475_s14   ;;  %s1067_s16 = sadd.s32 4294967294, %s1475_s14   ;;  %s1475_s14 = sphi %s1505_s14, %s15_s14   ;;  %s1471_s13 = sphi %s1503_s13, %s1849_s13   ;;  %s1467_s12 = sphi %s1501_s12, %s1848_s12   ;;  %s1463_s11 = sphi %s1499_s11, %s1847_s11   ;;  %s1459_s10 = sphi %s1497_s10, %s1846_s10   ;;  %s1455_s9 = sphi %s1495_s9, %s1845_s9  }
   0x5   : > { %s34_s17 = sadd.s32 1, %s1471_s13  ;;  %s99_s18 = sadd.s32 1, %s1463_s11 }
   0x6   : > { %p36_p0 = scmp.ge.s32.totalorder %s34_s17, 2  ;;  %p109_p1 = scmp.ne.s32.totalorder %s1463_s11, %s1459_s10 }
   0x7   : > { %p110_p2 = scmp.eq.s32.totalorder %s1066_s15, 1  ;;  %p115_p3 = scmp.ne.s32.totalorder %s1459_s10, %s1455_s9 }
   0x8   : > { %s1851_s17 = smov (%p36_p0, %s34_s17), 0  ;;  %p116_p5 = scmp.eq.s32.totalorder %s1067_s16, 1 }
   0x9   : > { %p1535_p4 = por %p110_p2, %p109_p1  ;;  %s94_s20 = ssub.s32 %s1471_s13, %s1851_s17 }
   0xa   : > { %p1071_p6 = scmp.ge.s32.totalorder %s1475_s14, 1  ;;  %p97_p7 = scmp.eq.s32.totalorder %s94_s20, 0 }
   0xb   : > { %p1542_p8 = por %p116_p5, %p115_p3  ;;  %p161_p9 = scmp.lt.s32.totalorder %s1475_s14, 3 }
   0xc   : > { %s1548_s22 = scalar_select %p97_p7, %s1463_s11, %s99_s18  }
   0xd   : > { %p162_p10 = pnand %p1071_p6, %p161_p9 }
   0xe   : > { %s1073_s7 = sshll.u32 (!%p162_p10), %s1467_s12, 5  ;;  %s193_s24 = sand.u32 (!%p162_p10), 1, %s1459_s10  }
   0xf   : > { %165 = sbr.rel (%p162_p10) target bundleno = 323 (0x143), region = 28  ;;  %p198_p11 = scmp.lt.s32.totalorder (!%p162_p10), %s1073_s7, 63 }
  0x10   : > { %s1072_s25 = sshll.u32 (!%p162_p10), %s193_s24, 7  ;;  %s1322_s27 = sshll.u32 (!%p162_p10), %s1467_s12, 7 }
  0x11   : > { %s1706_s26 = scalar_lea.vmem (!%p162_p10), [#allocation3], %s1072_s25  ;;  %s951_s12 = scalar_lea.sflag (!%p162_p10), [#allocation4], %s193_s24 }
  0x12   : > { %s964_s3 = sshll.u32 (!%p162_p10), %s1706_s26, 4  ;;  %s1417_s15 = scalar_lea.hbm (!%p162_p10), %s1842_s2, 256  ;;  %s965_s3 = int_to_ptr.vmem [resolvable:$true] %s964_s3 }
  0x14   : > { %v1313_v0 = vld [vmem:[%s1841_s1 + $0x38] sm:$0xff]  ;;  %v1312_v2 = vld [vmem:[%s1841_s1 + $0x30] sm:$0xff]  ;;  %v1311_v4 = vld [vmem:[%s1841_s1 + $0x28] sm:$0xff]  ;;  %s1853_s7 = smov (!%p198_p11, %s1073_s7), 63  ;;  %vm222_vm0 = vcmask 523264   ;;  %vm917_vm1 = vcmask 519168  }
  0x15   : > { %v1321_v1 = vld [vmem:[%s1841_s1 + $0x78] sm:$0xff]  ;;  %607 = vmatpush.bf16.msra.mxu0 %v1313_v0  ;;  %1323 = vmatpush.bf16.msra.mxu2 %v1313_v0  ;;  %v1320_v3 = vld [vmem:[%s1841_s1 + $0x70] sm:$0xff]  ;;  %v1319_v5 = vld [vmem:[%s1841_s1 + $0x68] sm:$0xff]  ;;  %s1273_s30 = sshll.u32 %s1853_s7, 3 }
  0x16   : > { %696 = vmatpush.bf16.msra.mxu1 %v1321_v1  ;;  %1331 = vmatpush.bf16.msra.mxu3 %v1321_v1  ;;  %v1310_v6 = vld [vmem:[%s1841_s1 + $0x20] sm:$0xff]  ;;  %v1309_v8 = vld [vmem:[%s1841_s1 + $0x18] sm:$0xff]  ;;  %v1308_v10 = vld [vmem:[%s1841_s1 + $0x10] sm:$0xff]  ;;  %s1593_s8 = scalar_lea.vmem %s1840_s0, %s1273_s30  ;;  %s963_s30 = scalar_lea.hbm %s1842_s2, %s1322_s27 }
  0x17   : > { %v1318_v7 = vld [vmem:[%s1841_s1 + $0x60] sm:$0xff]  ;;  %v1317_v9 = vld [vmem:[%s1841_s1 + $0x58] sm:$0xff]  ;;  %v1316_v11 = vld [vmem:[%s1841_s1 + $0x50] sm:$0xff]  ;;  %s966_s4 = sshll.u32 %s963_s30, 4  ;;  %s967_s4 = int_to_ptr.hbm [resolvable:$true] %s966_s4 }
  0x18   : > { %v1307_v12 = vld [vmem:[%s1841_s1 + $0x8] sm:$0xff]  ;;  %v1306_v14 = vld [vmem:[%s1841_s1] sm:$0xff]  ;;  %v1086_v28 = vld [vmem:[%s1593_s8 + $0x10] sm:$0xf]  ;;  %s1411_s5 = sshra.s32 %s967_s4, 4  ;;  %s1412_s5 = int_to_ptr.hbm [resolvable:$true] %s1411_s5 }
  0x19   : > { %608 = vmatpush.bf16.msra.mxu0 %v1312_v2  ;;  %1324 = vmatpush.bf16.msra.mxu2 %v1312_v2  ;;  %v1315_v13 = vld [vmem:[%s1841_s1 + $0x48] sm:$0xff]  ;;  %v1314_v15 = vld [vmem:[%s1841_s1 + $0x40] sm:$0xff]  ;;  %v1277_v29 = vld [vmem:[%s1593_s8 + $0x14] sm:$0xf0]  ;;  %s1413_s6 = scalar_lea.hbm %s1412_s5, 128  ;;  %p1418_p1 = scmp.lt.s32.totalorder %s1412_s5, %s1842_s2 }
  0x1a   : > { %697 = vmatpush.bf16.msra.mxu1 %v1320_v3  ;;  %1332 = vmatpush.bf16.msra.mxu3 %v1320_v3  ;;  %v1078_v16 = vld [vmem:[%s1593_s8] sm:$0xf]  ;;  %v1275_v17 = vld [vmem:[%s1593_s8 + $0x4] sm:$0xf0]  ;;  %v1274_v20 = vld [vmem:[%s1593_s8 + $0x4] sm:$0xf]  ;;  %v1087_v36 = vor.u32 %v1277_v29, %v1086_v28  ;;  %p1414_p12 = scmp.ne.s32.totalorder %s1412_s5, %s1413_s6  ;;  %p1419_p2 = scmp.lt.s32.totalorder %s1417_s15, %s1413_s6 }
  0x1b   : > { %v1142_v18 = vld [vmem:[%s1593_s8 + $0x80] sm:$0xf]  ;;  %v1291_v19 = vld [vmem:[%s1593_s8 + $0x84] sm:$0xf0]  ;;  %v1080_v21 = vld [vmem:[%s1593_s8 + $0x8] sm:$0xf0]  ;;  %v1079_v24 = vor.u32 %v1275_v17, %v1078_v16 }
  0x1c   : > { %v1290_v22 = vld [vmem:[%s1593_s8 + $0x84] sm:$0xf]  ;;  %v1144_v23 = vld [vmem:[%s1593_s8 + $0x88] sm:$0xf0]  ;;  %v1143_v25 = vor.u32 %v1291_v19, %v1142_v18  ;;  %v1083_v26 = vor.u32 %v1274_v20, %v1080_v21  ;;  %v1150_v30 = vld [vmem:[%s1593_s8 + $0x90] sm:$0xf]  ;;  %p1415_p13 = pnand %p1414_p12, %p1535_p4  ;;  %p1420_p3 = por %p1419_p2, %p1418_p1 }
  0x1d   : > { %609 = vmatpush.bf16.msra.mxu0 %v1311_v4  ;;  %1325 = vmatpush.bf16.msra.mxu2 %v1311_v4  ;;  %v1147_v27 = vor.u32 %v1290_v22, %v1144_v23  ;;  %v1293_v31 = vld [vmem:[%s1593_s8 + $0x94] sm:$0xf0]  ;;  %v1276_v32 = vld [vmem:[%s1593_s8 + $0x14] sm:$0xf]  ;;  %v1088_v33 = vld [vmem:[%s1593_s8 + $0x18] sm:$0xf0] }
  0x1e   : > { %698 = vmatpush.bf16.msra.mxu1 %v1319_v5  ;;  %1333 = vmatpush.bf16.msra.mxu3 %v1319_v5  ;;  %v1292_v34 = vld [vmem:[%s1593_s8 + $0x94] sm:$0xf]  ;;  %v1152_v35 = vld [vmem:[%s1593_s8 + $0x98] sm:$0xf0]  ;;  %v1151_v37 = vor.u32 %v1293_v31, %v1150_v30  ;;  %v1091_v38 = vor.u32 %v1276_v32, %v1088_v33  ;;  %v1094_v40 = vld [vmem:[%s1593_s8 + $0x20] sm:$0xf]  ;;  %p1416_p0 = pneg %p1415_p13 }
  0x1f   : > { %v1155_v39 = vor.u32 %v1292_v34, %v1152_v35  ;;  %v1279_v41 = vld [vmem:[%s1593_s8 + $0x24] sm:$0xf0]  ;;  %v1158_v42 = vld [vmem:[%s1593_s8 + $0xa0] sm:$0xf]  ;;  %v1278_v44 = vld [vmem:[%s1593_s8 + $0x24] sm:$0xf] }
  0x20   : > { %v1295_v43 = vld [vmem:[%s1593_s8 + $0xa4] sm:$0xf0]  ;;  %v1096_v45 = vld [vmem:[%s1593_s8 + $0x28] sm:$0xf0]  ;;  %v1294_v46 = vld [vmem:[%s1593_s8 + $0xa4] sm:$0xf]  ;;  %v1095_v48 = vor.u32 %v1279_v41, %v1094_v40  ;;  %p1421_p5 = pnand %p1420_p3, %p1416_p0 }
  0x21   : > { %610 = vmatpush.bf16.msra.mxu0 %v1310_v6  ;;  %1326 = vmatpush.bf16.msra.mxu2 %v1310_v6  ;;  %v1160_v47 = vld [vmem:[%s1593_s8 + $0xa8] sm:$0xf0]  ;;  %v1159_v49 = vor.u32 %v1295_v43, %v1158_v42  ;;  %v1099_v50 = vor.u32 %v1278_v44, %v1096_v45  ;;  %v1102_v52 = vld [vmem:[%s1593_s8 + $0x30] sm:$0xf]  ;;  %v1281_v53 = vld [vmem:[%s1593_s8 + $0x34] sm:$0xf0] }
  0x22   : > { %699 = vmatpush.bf16.msra.mxu1 %v1318_v7  ;;  %1334 = vmatpush.bf16.msra.mxu3 %v1318_v7  ;;  %v1163_v51 = vor.u32 %v1294_v46, %v1160_v47  ;;  %v1166_v54 = vld [vmem:[%s1593_s8 + $0xb0] sm:$0xf]  ;;  %v1297_v55 = vld [vmem:[%s1593_s8 + $0xb4] sm:$0xf0]  ;;  %v1280_v56 = vld [vmem:[%s1593_s8 + $0x34] sm:$0xf]  ;;  %v1103_v60 = vor.u32 %v1281_v53, %v1102_v52 }
  0x23   : > { %v1104_v57 = vld [vmem:[%s1593_s8 + $0x38] sm:$0xf0]  ;;  %v1296_v58 = vld [vmem:[%s1593_s8 + $0xb4] sm:$0xf]  ;;  %v1167_v61 = vor.u32 %v1297_v55, %v1166_v54  ;;  %v1110_v0 = vld [vmem:[%s1593_s8 + $0x40] sm:$0xf] }
  0x24   : > { %v1168_v59 = vld [vmem:[%s1593_s8 + $0xb8] sm:$0xf0]  ;;  %v1107_v62 = vor.u32 %v1280_v56, %v1104_v57  ;;  %v1283_v1 = vld [vmem:[%s1593_s8 + $0x44] sm:$0xf0]  ;;  %v1174_v2 = vld [vmem:[%s1593_s8 + $0xc0] sm:$0xf] }
  0x25   : > { %611 = vmatpush.bf16.msra.mxu0 %v1309_v8  ;;  %1327 = vmatpush.bf16.msra.mxu2 %v1309_v8  ;;  %v1171_v63 = vor.u32 %v1296_v58, %v1168_v59  ;;  %v1299_v3 = vld [vmem:[%s1593_s8 + $0xc4] sm:$0xf0]  ;;  %v1282_v4 = vld [vmem:[%s1593_s8 + $0x44] sm:$0xf]  ;;  %v1112_v5 = vld [vmem:[%s1593_s8 + $0x48] sm:$0xf0]  ;;  %v1111_v8 = vor.u32 %v1283_v1, %v1110_v0 }
  0x26   : > { %700 = vmatpush.bf16.msra.mxu1 %v1317_v9  ;;  %1335 = vmatpush.bf16.msra.mxu3 %v1317_v9  ;;  %v1298_v6 = vld [vmem:[%s1593_s8 + $0xc4] sm:$0xf]  ;;  %v1176_v7 = vld [vmem:[%s1593_s8 + $0xc8] sm:$0xf0]  ;;  %v1175_v9 = vor.u32 %v1299_v3, %v1174_v2  ;;  %v1284_v16 = vld [vmem:[%s1593_s8 + $0x54] sm:$0xf] }
  0x27   : > { %v1120_v17 = vld [vmem:[%s1593_s8 + $0x58] sm:$0xf0]  ;;  %v1300_v18 = vld [vmem:[%s1593_s8 + $0xd4] sm:$0xf]  ;;  %v1286_v28 = vld [vmem:[%s1593_s8 + $0x64] sm:$0xf] }
  0x28   : > { %v1184_v19 = vld [vmem:[%s1593_s8 + $0xd8] sm:$0xf0]  ;;  %v1123_v22 = vor.u32 %v1284_v16, %v1120_v17  ;;  %v1128_v29 = vld [vmem:[%s1593_s8 + $0x68] sm:$0xf0]  ;;  %v1302_v30 = vld [vmem:[%s1593_s8 + $0xe4] sm:$0xf] }
  0x29   : > { %612 = vmatpush.bf16.msra.mxu0 %v1308_v10  ;;  %1328 = vmatpush.bf16.msra.mxu2 %v1308_v10  ;;  %v1115_v10 = vor.u32 %v1282_v4, %v1112_v5  ;;  %v1187_v23 = vor.u32 %v1300_v18, %v1184_v19  ;;  %v1192_v31 = vld [vmem:[%s1593_s8 + $0xe8] sm:$0xf0]  ;;  %v1131_v34 = vor.u32 %v1286_v28, %v1128_v29  ;;  %v1305_v40 = vld [vmem:[%s1593_s8 + $0xf4] sm:$0xf0]  ;;  %v1288_v41 = vld [vmem:[%s1593_s8 + $0x74] sm:$0xf] }
  0x2a   : > { %701 = vmatpush.bf16.msra.mxu1 %v1316_v11  ;;  %1336 = vmatpush.bf16.msra.mxu3 %v1316_v11  ;;  %v1179_v11 = vor.u32 %v1298_v6, %v1176_v7  ;;  %v1195_v35 = vor.u32 %v1302_v30, %v1192_v31  ;;  %v1136_v42 = vld [vmem:[%s1593_s8 + $0x78] sm:$0xf0]  ;;  %v1304_v43 = vld [vmem:[%s1593_s8 + $0xf4] sm:$0xf] }
  0x2b   : > { %v1200_v44 = vld [vmem:[%s1593_s8 + $0xf8] sm:$0xf0]  ;;  %v1139_v47 = vor.u32 %v1288_v41, %v1136_v42 }
  0x2d   : > { %613 = vmatpush.bf16.msra.mxu0 %v1307_v12  ;;  %1329 = vmatpush.bf16.msra.mxu2 %v1307_v12  ;;  %v1118_v12 = vld [vmem:[%s1593_s8 + $0x50] sm:$0xf] }
  0x2e   : > { %702 = vmatpush.bf16.msra.mxu1 %v1315_v13  ;;  %1337 = vmatpush.bf16.msra.mxu3 %v1315_v13  ;;  %v1285_v13 = vld [vmem:[%s1593_s8 + $0x54] sm:$0xf0] }
  0x2f   : > { %v1119_v20 = vor.u32 %v1285_v13, %v1118_v12 }
  0x31   : > { %614 = vmatpush.bf16.msra.mxu0 %v1306_v14  ;;  %1330 = vmatpush.bf16.msra.mxu2 %v1306_v14  ;;  %v1182_v14 = vld [vmem:[%s1593_s8 + $0xd0] sm:$0xf] }
  0x32   : > { %703 = vmatpush.bf16.msra.mxu1 %v1314_v15  ;;  %1338 = vmatpush.bf16.msra.mxu3 %v1314_v15  ;;  %v1301_v15 = vld [vmem:[%s1593_s8 + $0xd4] sm:$0xf0] }
  0x33   : > { %v1183_v21 = vor.u32 %v1301_v15, %v1182_v14 }
  0x34   : > { %615 = vmatmul.bf16.vlgmr.msra.gmra.mxu0 %v1079_v24  ;;  %655 = vmatmul.bf16.vlgmr.msra.gmra.mxu2 %v1143_v25  ;;  %v1126_v24 = vld [vmem:[%s1593_s8 + $0x60] sm:$0xf]  ;;  %v1287_v25 = vld [vmem:[%s1593_s8 + $0x64] sm:$0xf0] }
  0x35   : > { %704 = vmatmul.bf16.vlgmr.msra.gmra.mxu1 %v1083_v26  ;;  %744 = vmatmul.bf16.vlgmr.msra.gmra.mxu3 %v1147_v27  ;;  %v1190_v26 = vld [vmem:[%s1593_s8 + $0xe0] sm:$0xf]  ;;  %v1303_v27 = vld [vmem:[%s1593_s8 + $0xe4] sm:$0xf0]  ;;  %v1127_v32 = vor.u32 %v1287_v25, %v1126_v24 }
  0x36   : > { %v1191_v33 = vor.u32 %v1303_v27, %v1190_v26 }
  0x44   : > { %620 = vmatmul.bf16.gmra.mxu0 %v1087_v36  ;;  %660 = vmatmul.bf16.gmra.mxu2 %v1151_v37  ;;  %v1477_v36 = vmov 0.0   ;;  %v1134_v37 = vld [vmem:[%s1593_s8 + $0x70] sm:$0xf] }
  0x45   : > { %709 = vmatmul.bf16.gmra.mxu1 %v1091_v38  ;;  %749 = vmatmul.bf16.gmra.mxu3 %v1155_v39  ;;  %223 = vst.msk [vmem:[#allocation2] sm:$0xff] %vm222_vm0, %v1477_v36  ;;  %v1289_v38 = vld [vmem:[%s1593_s8 + $0x74] sm:$0xf0]  ;;  %v1198_v39 = vld [vmem:[%s1593_s8 + $0xf0] sm:$0xf] }
  0x46   : > { %224 = vst.msk [vmem:[#allocation2 + $0x8] sm:$0xff] %vm222_vm0, %v1477_v36  ;;  %v1135_v45 = vor.u32 %v1289_v38, %v1134_v37  ;;  %v1199_v46 = vor.u32 %v1305_v40, %v1198_v39 }
  0x47   : > { %225 = vst.msk [vmem:[#allocation2 + $0x10] sm:$0xff] %vm222_vm0, %v1477_v36 }
  0x48   : > { %226 = vst.msk [vmem:[#allocation2 + $0x18] sm:$0xff] %vm222_vm0, %v1477_v36 }
  0x49   : > { %227 = vst.msk [vmem:[#allocation2 + $0x20] sm:$0xff] %vm222_vm0, %v1477_v36 }
  0x4a   : > { %228 = vst.msk [vmem:[#allocation2 + $0x28] sm:$0xff] %vm222_vm0, %v1477_v36 }
  0x4b   : > { %229 = vst.msk [vmem:[#allocation2 + $0x30] sm:$0xff] %vm222_vm0, %v1477_v36 }
  0x4c   : > { %230 = vst.msk [vmem:[#allocation2 + $0x38] sm:$0xff] %vm222_vm0, %v1477_v36 }
  0x4d   : > { %231 = vst.msk [vmem:[#allocation2 + $0x40] sm:$0xff] %vm222_vm0, %v1477_v36  ;;  %v256_v59 = vld [vmem:[#allocation2 + $0x8] sm:$0xff] }
  0x4e   : > { %232 = vst.msk [vmem:[#allocation2 + $0x48] sm:$0xff] %vm222_vm0, %v1477_v36  ;;  %v257_v7 = vld [vmem:[#allocation2 + $0x10] sm:$0xff] }
  0x4f   : > { %233 = vst.msk [vmem:[#allocation2 + $0x50] sm:$0xff] %vm222_vm0, %v1477_v36 }
  0x50   : > { %234 = vst.msk [vmem:[#allocation2 + $0x58] sm:$0xff] %vm222_vm0, %v1477_v36 }
  0x51   : > { %235 = vst.msk [vmem:[#allocation2 + $0x60] sm:$0xff] %vm222_vm0, %v1477_v36 }
  0x52   : > { %236 = vst.msk [vmem:[#allocation2 + $0x68] sm:$0xff] %vm222_vm0, %v1477_v36 }
  0x53   : > { %237 = vst.msk [vmem:[#allocation2 + $0x70] sm:$0xff] %vm222_vm0, %v1477_v36 }
  0x54   : > { %625 = vmatmul.bf16.gmra.mxu0 %v1095_v48  ;;  %665 = vmatmul.bf16.gmra.mxu2 %v1159_v49  ;;  %v1203_v48 = vor.u32 %v1304_v43, %v1200_v44  ;;  %238 = vst.msk [vmem:[#allocation2 + $0x78] sm:$0xff] %vm222_vm0, %v1477_v36 }
  0x55   : > { %714 = vmatmul.bf16.gmra.mxu1 %v1099_v50  ;;  %754 = vmatmul.bf16.gmra.mxu3 %v1163_v51  ;;  %239 = vst.msk [vmem:[#allocation2 + $0x80] sm:$0xff] %vm222_vm0, %v1477_v36  ;;  %v255_v50 = vld [vmem:[#allocation2] sm:$0xff] }
  0x56   : > { %240 = vst.msk [vmem:[#allocation2 + $0x88] sm:$0xff] %vm222_vm0, %v1477_v36 }
  0x57   : > { %241 = vst.msk [vmem:[#allocation2 + $0x90] sm:$0xff] %vm222_vm0, %v1477_v36 }
  0x58   : > { %242 = vst.msk [vmem:[#allocation2 + $0x98] sm:$0xff] %vm222_vm0, %v1477_v36 }
  0x59   : > { %243 = vst.msk [vmem:[#allocation2 + $0xa0] sm:$0xff] %vm222_vm0, %v1477_v36 }
  0x5a   : > { %244 = vst.msk [vmem:[#allocation2 + $0xa8] sm:$0xff] %vm222_vm0, %v1477_v36 }
  0x5b   : > { %245 = vst.msk [vmem:[#allocation2 + $0xb0] sm:$0xff] %vm222_vm0, %v1477_v36 }
  0x5c   : > { %246 = vst.msk [vmem:[#allocation2 + $0xb8] sm:$0xff] %vm222_vm0, %v1477_v36  ;;  %v271_v55 = vld [vmem:[#allocation2 + $0x80] sm:$0xff] }
  0x5d   : > { %247 = vst.msk [vmem:[#allocation2 + $0xc0] sm:$0xff] %vm222_vm0, %v1477_v36  ;;  %v272_v3 = vld [vmem:[#allocation2 + $0x88] sm:$0xff] }
  0x5e   : > { %248 = vst.msk [vmem:[#allocation2 + $0xc8] sm:$0xff] %vm222_vm0, %v1477_v36  ;;  %v273_v17 = vld [vmem:[#allocation2 + $0x90] sm:$0xff] }
  0x5f   : > { %249 = vst.msk [vmem:[#allocation2 + $0xd0] sm:$0xff] %vm222_vm0, %v1477_v36  ;;  %v274_v31 = vld [vmem:[#allocation2 + $0x98] sm:$0xff] }
  0x60   : > { %250 = vst.msk [vmem:[#allocation2 + $0xd8] sm:$0xff] %vm222_vm0, %v1477_v36 }
  0x61   : > { %251 = vst.msk [vmem:[#allocation2 + $0xe0] sm:$0xff] %vm222_vm0, %v1477_v36 }
  0x62   : > { %252 = vst.msk [vmem:[#allocation2 + $0xe8] sm:$0xff] %vm222_vm0, %v1477_v36 }
  0x63   : > { %253 = vst.msk [vmem:[#allocation2 + $0xf0] sm:$0xff] %vm222_vm0, %v1477_v36 }
  0x64   : > { %630 = vmatmul.bf16.gmra.mxu0 %v1103_v60  ;;  %670 = vmatmul.bf16.gmra.mxu2 %v1167_v61  ;;  %254 = vst.msk [vmem:[#allocation2 + $0xf8] sm:$0xff] %vm222_vm0, %v1477_v36 }
  0x65   : > { %719 = vmatmul.bf16.gmra.mxu1 %v1107_v62  ;;  %759 = vmatmul.bf16.gmra.mxu3 %v1171_v63 }
  0x74   : > { %635 = vmatmul.bf16.gmra.mxu0 %v1111_v8  ;;  %675 = vmatmul.bf16.gmra.mxu2 %v1175_v9 }
  0x75   : > { %724 = vmatmul.bf16.gmra.mxu1 %v1115_v10  ;;  %764 = vmatmul.bf16.gmra.mxu3 %v1179_v11 }
  0x84   : > { %640 = vmatmul.bf16.gmra.mxu0 %v1119_v20  ;;  %680 = vmatmul.bf16.gmra.mxu2 %v1183_v21  ;;  %v258_v21 = vld [vmem:[#allocation2 + $0x18] sm:$0xff] }
  0x85   : > { %729 = vmatmul.bf16.gmra.mxu1 %v1123_v22  ;;  %769 = vmatmul.bf16.gmra.mxu3 %v1187_v23 }
  0x94   : > { %645 = vmatmul.bf16.gmra.mxu0 %v1127_v32  ;;  %685 = vmatmul.bf16.gmra.mxu2 %v1191_v33 }
  0x95   : > { %734 = vmatmul.bf16.gmra.mxu1 %v1131_v34  ;;  %774 = vmatmul.bf16.gmra.mxu3 %v1195_v35  ;;  %v259_v35 = vld [vmem:[#allocation2 + $0x20] sm:$0xff] }
  0xa4   : > { %650 = vmatmul.bf16.gmra.mxu0 %v1135_v45  ;;  %690 = vmatmul.bf16.gmra.mxu2 %v1199_v46  ;;  %v275_v45 = vld [vmem:[#allocation2 + $0xa0] sm:$0xff] }
  0xa5   : > { %739 = vmatmul.bf16.gmra.mxu1 %v1139_v47  ;;  %779 = vmatmul.bf16.gmra.mxu3 %v1203_v48 }
  0xb1   : > { %v616_v49 = vpop.f32.mrf.mxu0 }
  0xb2   : > { %v705_v51 = vpop.f32.mrf.mxu1 }
  0xb3   : > { %v706_v52 = vadd.f32 %v705_v51, %v616_v49  ;;  %v260_v49 = vld [vmem:[#allocation2 + $0x28] sm:$0xff] }
  0xb5   : > { %v785_v53 = vadd.f32 %v706_v52, %v255_v50 }
  0xb7   : > { %818 = vst.msk [vmem:[#allocation2] sm:$0xff] %vm222_vm0, %v785_v53  ;;  %v656_v54 = vpop.f32.mrf.mxu2 }
  0xb8   : > { %v745_v56 = vpop.f32.mrf.mxu3 }
  0xb9   : > { %v746_v57 = vadd.f32 %v745_v56, %v656_v54  ;;  %v618_v58 = vpop.f32.mrf.mxu0 }
  0xba   : > { %v707_v60 = vpop.f32.mrf.mxu1 }
  0xbb   : > { %v801_v61 = vadd.f32 %v746_v57, %v271_v55  ;;  %v708_v62 = vadd.f32 %v707_v60, %v618_v58 }
  0xbd   : > { %834 = vst.msk [vmem:[#allocation2 + $0x80] sm:$0xff] %vm222_vm0, %v801_v61  ;;  %v786_v63 = vadd.f32 %v708_v62, %v256_v59  ;;  %v276_v59 = vld [vmem:[#allocation2 + $0xa8] sm:$0xff] }
  0xbe   : > { %v853_v0 = vld [vmem:[#allocation2] sm:$0xff] }
  0xbf   : > { %v885_v1 = vpack.c.bf16 %v853_v0, %v853_v0  ;;  %819 = vst.msk [vmem:[#allocation2 + $0x8] sm:$0xff] %vm222_vm0, %v786_v63  ;;  %v658_v2 = vpop.f32.mrf.mxu2  ;;  %v261_v63 = vld [vmem:[#allocation2 + $0x30] sm:$0xff] }
  0xc0   : > { %v747_v4 = vpop.f32.mrf.mxu3 }
  0xc1   : > { %918 = vst.msk [vmem:[%s1706_s26] sm:$0xf] %vm917_vm1, %v885_v1  ;;  %v748_v5 = vadd.f32 %v747_v4, %v658_v2  ;;  %v621_v6 = vpop.f32.mrf.mxu0 }
  0xc2   : > { %v710_v8 = vpop.f32.mrf.mxu1 }
  0xc3   : > { %v802_v9 = vadd.f32 %v748_v5, %v272_v3  ;;  %v711_v10 = vadd.f32 %v710_v8, %v621_v6 }
  0xc4   : > { %v869_v11 = vld [vmem:[#allocation2 + $0x80] sm:$0xff] }
  0xc5   : > { %v901_v12 = vpack.c.bf16 %v869_v11, %v869_v11  ;;  %835 = vst.msk [vmem:[#allocation2 + $0x88] sm:$0xff] %vm222_vm0, %v802_v9  ;;  %v787_v13 = vadd.f32 %v711_v10, %v257_v7  ;;  %v277_v9 = vld [vmem:[#allocation2 + $0xb0] sm:$0xff] }
  0xc6   : > { %v854_v14 = vld [vmem:[#allocation2 + $0x8] sm:$0xff] }
  0xc7   : > { %934 = vst.msk [vmem:[%s1706_s26 + $0x40] sm:$0xf] %vm917_vm1, %v901_v12  ;;  %v886_v15 = vpack.c.bf16 %v854_v14, %v854_v14  ;;  %v661_v16 = vpop.f32.mrf.mxu2 }
  0xc8   : > { %820 = vst.msk [vmem:[#allocation2 + $0x10] sm:$0xff] %vm222_vm0, %v787_v13  ;;  %v750_v18 = vpop.f32.mrf.mxu3  ;;  %v262_v13 = vld [vmem:[#allocation2 + $0x38] sm:$0xff] }
  0xc9   : > { %919 = vst.msk [vmem:[%s1706_s26 + $0x4] sm:$0xf] %vm917_vm1, %v886_v15  ;;  %v751_v19 = vadd.f32 %v750_v18, %v661_v16  ;;  %v623_v20 = vpop.f32.mrf.mxu0 }
  0xca   : > { %v712_v22 = vpop.f32.mrf.mxu1 }
  0xcb   : > { %v803_v23 = vadd.f32 %v751_v19, %v273_v17  ;;  %v713_v24 = vadd.f32 %v712_v22, %v623_v20 }
  0xcc   : > { %v870_v25 = vld [vmem:[#allocation2 + $0x88] sm:$0xff] }
  0xcd   : > { %v902_v26 = vpack.c.bf16 %v870_v25, %v870_v25  ;;  %836 = vst.msk [vmem:[#allocation2 + $0x90] sm:$0xff] %vm222_vm0, %v803_v23  ;;  %v788_v27 = vadd.f32 %v713_v24, %v258_v21  ;;  %v278_v23 = vld [vmem:[#allocation2 + $0xb8] sm:$0xff] }
  0xcf   : > { %935 = vst.msk [vmem:[%s1706_s26 + $0x44] sm:$0xf] %vm917_vm1, %v902_v26  ;;  %v855_v28 = vld [vmem:[#allocation2 + $0x10] sm:$0xff]  ;;  %v663_v29 = vpop.f32.mrf.mxu2 }
  0xd0   : > { %v887_v30 = vpack.c.bf16 %v855_v28, %v855_v28  ;;  %821 = vst.msk [vmem:[#allocation2 + $0x18] sm:$0xff] %vm222_vm0, %v788_v27  ;;  %v752_v32 = vpop.f32.mrf.mxu3  ;;  %v263_v27 = vld [vmem:[#allocation2 + $0x40] sm:$0xff] }
  0xd1   : > { %v753_v33 = vadd.f32 %v752_v32, %v663_v29  ;;  %v626_v34 = vpop.f32.mrf.mxu0 }
  0xd2   : > { %920 = vst.msk [vmem:[%s1706_s26 + $0x8] sm:$0xf] %vm917_vm1, %v887_v30  ;;  %v715_v36 = vpop.f32.mrf.mxu1 }
  0xd3   : > { %v804_v37 = vadd.f32 %v753_v33, %v274_v31  ;;  %v716_v38 = vadd.f32 %v715_v36, %v626_v34 }
  0xd4   : > { %v871_v39 = vld [vmem:[#allocation2 + $0x90] sm:$0xff] }
  0xd5   : > { %v903_v40 = vpack.c.bf16 %v871_v39, %v871_v39  ;;  %837 = vst.msk [vmem:[#allocation2 + $0x98] sm:$0xff] %vm222_vm0, %v804_v37  ;;  %v789_v41 = vadd.f32 %v716_v38, %v259_v35  ;;  %v279_v37 = vld [vmem:[#allocation2 + $0xc0] sm:$0xff] }
  0xd7   : > { %936 = vst.msk [vmem:[%s1706_s26 + $0x48] sm:$0xf] %vm917_vm1, %v903_v40  ;;  %v856_v42 = vld [vmem:[#allocation2 + $0x18] sm:$0xff]  ;;  %v666_v43 = vpop.f32.mrf.mxu2 }
  0xd8   : > { %v888_v44 = vpack.c.bf16 %v856_v42, %v856_v42  ;;  %822 = vst.msk [vmem:[#allocation2 + $0x20] sm:$0xff] %vm222_vm0, %v789_v41  ;;  %v755_v46 = vpop.f32.mrf.mxu3  ;;  %v264_v41 = vld [vmem:[#allocation2 + $0x48] sm:$0xff] }
  0xd9   : > { %v756_v47 = vadd.f32 %v755_v46, %v666_v43  ;;  %v628_v48 = vpop.f32.mrf.mxu0 }
  0xda   : > { %921 = vst.msk [vmem:[%s1706_s26 + $0xc] sm:$0xf] %vm917_vm1, %v888_v44  ;;  %v717_v50 = vpop.f32.mrf.mxu1 }
  0xdb   : > { %v805_v51 = vadd.f32 %v756_v47, %v275_v45  ;;  %v718_v52 = vadd.f32 %v717_v50, %v628_v48 }
  0xdc   : > { %v872_v53 = vld [vmem:[#allocation2 + $0x98] sm:$0xff] }
  0xdd   : > { %v904_v54 = vpack.c.bf16 %v872_v53, %v872_v53  ;;  %838 = vst.msk [vmem:[#allocation2 + $0xa0] sm:$0xff] %vm222_vm0, %v805_v51  ;;  %v790_v55 = vadd.f32 %v718_v52, %v260_v49  ;;  %v280_v51 = vld [vmem:[#allocation2 + $0xc8] sm:$0xff] }
  0xdf   : > { %937 = vst.msk [vmem:[%s1706_s26 + $0x4c] sm:$0xf] %vm917_vm1, %v904_v54  ;;  %v857_v56 = vld [vmem:[#allocation2 + $0x20] sm:$0xff]  ;;  %v668_v57 = vpop.f32.mrf.mxu2 }
  0xe0   : > { %v889_v58 = vpack.c.bf16 %v857_v56, %v857_v56  ;;  %823 = vst.msk [vmem:[#allocation2 + $0x28] sm:$0xff] %vm222_vm0, %v790_v55  ;;  %v757_v60 = vpop.f32.mrf.mxu3  ;;  %v265_v55 = vld [vmem:[#allocation2 + $0x50] sm:$0xff] }
  0xe1   : > { %v758_v61 = vadd.f32 %v757_v60, %v668_v57  ;;  %v631_v62 = vpop.f32.mrf.mxu0 }
  0xe2   : > { %922 = vst.msk [vmem:[%s1706_s26 + $0x10] sm:$0xf] %vm917_vm1, %v889_v58  ;;  %v720_v0 = vpop.f32.mrf.mxu1 }
  0xe3   : > { %v806_v1 = vadd.f32 %v758_v61, %v276_v59  ;;  %v721_v2 = vadd.f32 %v720_v0, %v631_v62 }
  0xe4   : > { %v873_v3 = vld [vmem:[#allocation2 + $0xa0] sm:$0xff] }
  0xe5   : > { %v905_v4 = vpack.c.bf16 %v873_v3, %v873_v3  ;;  %839 = vst.msk [vmem:[#allocation2 + $0xa8] sm:$0xff] %vm222_vm0, %v806_v1  ;;  %v791_v5 = vadd.f32 %v721_v2, %v261_v63  ;;  %v281_v1 = vld [vmem:[#allocation2 + $0xd0] sm:$0xff] }
  0xe7   : > { %938 = vst.msk [vmem:[%s1706_s26 + $0x50] sm:$0xf] %vm917_vm1, %v905_v4  ;;  %v858_v6 = vld [vmem:[#allocation2 + $0x28] sm:$0xff]  ;;  %v671_v7 = vpop.f32.mrf.mxu2 }
  0xe8   : > { %v890_v8 = vpack.c.bf16 %v858_v6, %v858_v6  ;;  %824 = vst.msk [vmem:[#allocation2 + $0x30] sm:$0xff] %vm222_vm0, %v791_v5  ;;  %v760_v10 = vpop.f32.mrf.mxu3  ;;  %v266_v5 = vld [vmem:[#allocation2 + $0x58] sm:$0xff] }
  0xe9   : > { %v761_v11 = vadd.f32 %v760_v10, %v671_v7  ;;  %v633_v12 = vpop.f32.mrf.mxu0 }
  0xea   : > { %923 = vst.msk [vmem:[%s1706_s26 + $0x14] sm:$0xf] %vm917_vm1, %v890_v8  ;;  %v722_v14 = vpop.f32.mrf.mxu1 }
  0xeb   : > { %v807_v15 = vadd.f32 %v761_v11, %v277_v9  ;;  %v723_v16 = vadd.f32 %v722_v14, %v633_v12 }
  0xec   : > { %v874_v17 = vld [vmem:[#allocation2 + $0xa8] sm:$0xff] }
  0xed   : > { %v906_v18 = vpack.c.bf16 %v874_v17, %v874_v17  ;;  %840 = vst.msk [vmem:[#allocation2 + $0xb0] sm:$0xff] %vm222_vm0, %v807_v15  ;;  %v792_v19 = vadd.f32 %v723_v16, %v262_v13  ;;  %v282_v15 = vld [vmem:[#allocation2 + $0xd8] sm:$0xff] }
  0xef   : > { %939 = vst.msk [vmem:[%s1706_s26 + $0x54] sm:$0xf] %vm917_vm1, %v906_v18  ;;  %v859_v20 = vld [vmem:[#allocation2 + $0x30] sm:$0xff]  ;;  %v673_v21 = vpop.f32.mrf.mxu2 }
  0xf0   : > { %v891_v22 = vpack.c.bf16 %v859_v20, %v859_v20  ;;  %825 = vst.msk [vmem:[#allocation2 + $0x38] sm:$0xff] %vm222_vm0, %v792_v19  ;;  %v762_v24 = vpop.f32.mrf.mxu3  ;;  %v267_v19 = vld [vmem:[#allocation2 + $0x60] sm:$0xff] }
  0xf1   : > { %v763_v25 = vadd.f32 %v762_v24, %v673_v21  ;;  %v636_v26 = vpop.f32.mrf.mxu0 }
  0xf2   : > { %924 = vst.msk [vmem:[%s1706_s26 + $0x18] sm:$0xf] %vm917_vm1, %v891_v22  ;;  %v725_v28 = vpop.f32.mrf.mxu1 }
  0xf3   : > { %v808_v29 = vadd.f32 %v763_v25, %v278_v23  ;;  %v726_v30 = vadd.f32 %v725_v28, %v636_v26 }
  0xf4   : > { %v875_v31 = vld [vmem:[#allocation2 + $0xb0] sm:$0xff] }
  0xf5   : > { %v907_v32 = vpack.c.bf16 %v875_v31, %v875_v31  ;;  %841 = vst.msk [vmem:[#allocation2 + $0xb8] sm:$0xff] %vm222_vm0, %v808_v29  ;;  %v793_v33 = vadd.f32 %v726_v30, %v263_v27  ;;  %v283_v29 = vld [vmem:[#allocation2 + $0xe0] sm:$0xff] }
  0xf7   : > { %940 = vst.msk [vmem:[%s1706_s26 + $0x58] sm:$0xf] %vm917_vm1, %v907_v32  ;;  %v860_v34 = vld [vmem:[#allocation2 + $0x38] sm:$0xff]  ;;  %v676_v35 = vpop.f32.mrf.mxu2 }
  0xf8   : > { %v892_v36 = vpack.c.bf16 %v860_v34, %v860_v34  ;;  %826 = vst.msk [vmem:[#allocation2 + $0x40] sm:$0xff] %vm222_vm0, %v793_v33  ;;  %v765_v38 = vpop.f32.mrf.mxu3  ;;  %v268_v33 = vld [vmem:[#allocation2 + $0x68] sm:$0xff] }
  0xf9   : > { %v766_v39 = vadd.f32 %v765_v38, %v676_v35  ;;  %v638_v40 = vpop.f32.mrf.mxu0 }
  0xfa   : > { %925 = vst.msk [vmem:[%s1706_s26 + $0x1c] sm:$0xf] %vm917_vm1, %v892_v36  ;;  %v727_v42 = vpop.f32.mrf.mxu1 }
  0xfb   : > { %v809_v43 = vadd.f32 %v766_v39, %v279_v37  ;;  %v728_v44 = vadd.f32 %v727_v42, %v638_v40 }
  0xfc   : > { %v876_v45 = vld [vmem:[#allocation2 + $0xb8] sm:$0xff] }
  0xfd   : > { %v908_v46 = vpack.c.bf16 %v876_v45, %v876_v45  ;;  %842 = vst.msk [vmem:[#allocation2 + $0xc0] sm:$0xff] %vm222_vm0, %v809_v43  ;;  %v794_v47 = vadd.f32 %v728_v44, %v264_v41  ;;  %v284_v43 = vld [vmem:[#allocation2 + $0xe8] sm:$0xff] }
  0xff   : > { %941 = vst.msk [vmem:[%s1706_s26 + $0x5c] sm:$0xf] %vm917_vm1, %v908_v46  ;;  %v861_v48 = vld [vmem:[#allocation2 + $0x40] sm:$0xff]  ;;  %v678_v49 = vpop.f32.mrf.mxu2 }
 0x100   : > { %v893_v50 = vpack.c.bf16 %v861_v48, %v861_v48  ;;  %827 = vst.msk [vmem:[#allocation2 + $0x48] sm:$0xff] %vm222_vm0, %v794_v47  ;;  %v767_v52 = vpop.f32.mrf.mxu3  ;;  %v269_v47 = vld [vmem:[#allocation2 + $0x70] sm:$0xff] }
 0x101   : > { %v768_v53 = vadd.f32 %v767_v52, %v678_v49  ;;  %v641_v54 = vpop.f32.mrf.mxu0 }
 0x102   : > { %926 = vst.msk [vmem:[%s1706_s26 + $0x20] sm:$0xf] %vm917_vm1, %v893_v50  ;;  %v730_v56 = vpop.f32.mrf.mxu1 }
 0x103   : > { %v810_v57 = vadd.f32 %v768_v53, %v280_v51  ;;  %v731_v58 = vadd.f32 %v730_v56, %v641_v54 }
 0x104   : > { %v877_v59 = vld [vmem:[#allocation2 + $0xc0] sm:$0xff] }
 0x105   : > { %v909_v60 = vpack.c.bf16 %v877_v59, %v877_v59  ;;  %843 = vst.msk [vmem:[#allocation2 + $0xc8] sm:$0xff] %vm222_vm0, %v810_v57  ;;  %v795_v61 = vadd.f32 %v731_v58, %v265_v55  ;;  %v285_v57 = vld [vmem:[#allocation2 + $0xf0] sm:$0xff] }
 0x107   : > { %942 = vst.msk [vmem:[%s1706_s26 + $0x60] sm:$0xf] %vm917_vm1, %v909_v60  ;;  %v862_v62 = vld [vmem:[#allocation2 + $0x48] sm:$0xff]  ;;  %v681_v63 = vpop.f32.mrf.mxu2 }
 0x108   : > { %v894_v0 = vpack.c.bf16 %v862_v62, %v862_v62  ;;  %828 = vst.msk [vmem:[#allocation2 + $0x50] sm:$0xff] %vm222_vm0, %v795_v61  ;;  %v770_v2 = vpop.f32.mrf.mxu3  ;;  %v270_v61 = vld [vmem:[#allocation2 + $0x78] sm:$0xff] }
 0x109   : > { %v771_v3 = vadd.f32 %v770_v2, %v681_v63  ;;  %v643_v4 = vpop.f32.mrf.mxu0 }
 0x10a   : > { %927 = vst.msk [vmem:[%s1706_s26 + $0x24] sm:$0xf] %vm917_vm1, %v894_v0  ;;  %v732_v6 = vpop.f32.mrf.mxu1 }
 0x10b   : > { %v811_v7 = vadd.f32 %v771_v3, %v281_v1  ;;  %v733_v8 = vadd.f32 %v732_v6, %v643_v4 }
 0x10c   : > { %v878_v9 = vld [vmem:[#allocation2 + $0xc8] sm:$0xff] }
 0x10d   : > { %v910_v10 = vpack.c.bf16 %v878_v9, %v878_v9  ;;  %844 = vst.msk [vmem:[#allocation2 + $0xd0] sm:$0xff] %vm222_vm0, %v811_v7  ;;  %v796_v11 = vadd.f32 %v733_v8, %v266_v5  ;;  %v286_v7 = vld [vmem:[#allocation2 + $0xf8] sm:$0xff] }
 0x10f   : > { %943 = vst.msk [vmem:[%s1706_s26 + $0x64] sm:$0xf] %vm917_vm1, %v910_v10  ;;  %v863_v12 = vld [vmem:[#allocation2 + $0x50] sm:$0xff]  ;;  %v683_v13 = vpop.f32.mrf.mxu2 }
 0x110   : > { %v895_v14 = vpack.c.bf16 %v863_v12, %v863_v12  ;;  %829 = vst.msk [vmem:[#allocation2 + $0x58] sm:$0xff] %vm222_vm0, %v796_v11  ;;  %v772_v16 = vpop.f32.mrf.mxu3 }
 0x111   : > { %v773_v17 = vadd.f32 %v772_v16, %v683_v13  ;;  %v646_v18 = vpop.f32.mrf.mxu0 }
 0x112   : > { %928 = vst.msk [vmem:[%s1706_s26 + $0x28] sm:$0xf] %vm917_vm1, %v895_v14  ;;  %v735_v20 = vpop.f32.mrf.mxu1 }
 0x113   : > { %v812_v21 = vadd.f32 %v773_v17, %v282_v15  ;;  %v736_v22 = vadd.f32 %v735_v20, %v646_v18 }
 0x114   : > { %v879_v23 = vld [vmem:[#allocation2 + $0xd0] sm:$0xff] }
 0x115   : > { %v911_v24 = vpack.c.bf16 %v879_v23, %v879_v23  ;;  %845 = vst.msk [vmem:[#allocation2 + $0xd8] sm:$0xff] %vm222_vm0, %v812_v21  ;;  %v797_v25 = vadd.f32 %v736_v22, %v267_v19 }
 0x117   : > { %944 = vst.msk [vmem:[%s1706_s26 + $0x68] sm:$0xf] %vm917_vm1, %v911_v24  ;;  %v864_v26 = vld [vmem:[#allocation2 + $0x58] sm:$0xff]  ;;  %v686_v27 = vpop.f32.mrf.mxu2 }
 0x118   : > { %v896_v28 = vpack.c.bf16 %v864_v26, %v864_v26  ;;  %830 = vst.msk [vmem:[#allocation2 + $0x60] sm:$0xff] %vm222_vm0, %v797_v25  ;;  %v775_v30 = vpop.f32.mrf.mxu3 }
 0x119   : > { %v776_v31 = vadd.f32 %v775_v30, %v686_v27  ;;  %v648_v32 = vpop.f32.mrf.mxu0 }
 0x11a   : > { %929 = vst.msk [vmem:[%s1706_s26 + $0x2c] sm:$0xf] %vm917_vm1, %v896_v28  ;;  %v737_v34 = vpop.f32.mrf.mxu1 }
 0x11b   : > { %v813_v35 = vadd.f32 %v776_v31, %v283_v29  ;;  %v738_v36 = vadd.f32 %v737_v34, %v648_v32 }
 0x11c   : > { %v880_v37 = vld [vmem:[#allocation2 + $0xd8] sm:$0xff] }
 0x11d   : > { %v912_v38 = vpack.c.bf16 %v880_v37, %v880_v37  ;;  %846 = vst.msk [vmem:[#allocation2 + $0xe0] sm:$0xff] %vm222_vm0, %v813_v35  ;;  %v798_v39 = vadd.f32 %v738_v36, %v268_v33 }
 0x11f   : > { %945 = vst.msk [vmem:[%s1706_s26 + $0x6c] sm:$0xf] %vm917_vm1, %v912_v38  ;;  %v865_v40 = vld [vmem:[#allocation2 + $0x60] sm:$0xff]  ;;  %v688_v41 = vpop.f32.mrf.mxu2 }
 0x120   : > { %v897_v42 = vpack.c.bf16 %v865_v40, %v865_v40  ;;  %831 = vst.msk [vmem:[#allocation2 + $0x68] sm:$0xff] %vm222_vm0, %v798_v39  ;;  %v777_v44 = vpop.f32.mrf.mxu3 }
 0x121   : > { %v778_v45 = vadd.f32 %v777_v44, %v688_v41  ;;  %v651_v46 = vpop.f32.mrf.mxu0 }
 0x122   : > { %930 = vst.msk [vmem:[%s1706_s26 + $0x30] sm:$0xf] %vm917_vm1, %v897_v42  ;;  %v740_v48 = vpop.f32.mrf.mxu1 }
 0x123   : > { %v814_v49 = vadd.f32 %v778_v45, %v284_v43  ;;  %v741_v50 = vadd.f32 %v740_v48, %v651_v46 }
 0x124   : > { %v881_v51 = vld [vmem:[#allocation2 + $0xe0] sm:$0xff] }
 0x125   : > { %v913_v52 = vpack.c.bf16 %v881_v51, %v881_v51  ;;  %847 = vst.msk [vmem:[#allocation2 + $0xe8] sm:$0xff] %vm222_vm0, %v814_v49  ;;  %v799_v53 = vadd.f32 %v741_v50, %v269_v47 }
 0x127   : > { %946 = vst.msk [vmem:[%s1706_s26 + $0x70] sm:$0xf] %vm917_vm1, %v913_v52  ;;  %v866_v54 = vld [vmem:[#allocation2 + $0x68] sm:$0xff]  ;;  %v691_v55 = vpop.f32.mrf.mxu2 }
 0x128   : > { %v898_v56 = vpack.c.bf16 %v866_v54, %v866_v54  ;;  %832 = vst.msk [vmem:[#allocation2 + $0x70] sm:$0xff] %vm222_vm0, %v799_v53  ;;  %v780_v58 = vpop.f32.mrf.mxu3 }
 0x129   : > { %v781_v59 = vadd.f32 %v780_v58, %v691_v55  ;;  %v653_v60 = vpop.f32.mrf.mxu0 }
 0x12a   : > { %931 = vst.msk [vmem:[%s1706_s26 + $0x34] sm:$0xf] %vm917_vm1, %v898_v56  ;;  %v742_v62 = vpop.f32.mrf.mxu1 }
 0x12b   : > { %v815_v63 = vadd.f32 %v781_v59, %v285_v57  ;;  %v743_v0 = vadd.f32 %v742_v62, %v653_v60 }
 0x12c   : > { %v882_v1 = vld [vmem:[#allocation2 + $0xe8] sm:$0xff] }
 0x12d   : > { %v914_v2 = vpack.c.bf16 %v882_v1, %v882_v1  ;;  %848 = vst.msk [vmem:[#allocation2 + $0xf0] sm:$0xff] %vm222_vm0, %v815_v63  ;;  %v800_v3 = vadd.f32 %v743_v0, %v270_v61 }
 0x12f   : > { %947 = vst.msk [vmem:[%s1706_s26 + $0x74] sm:$0xf] %vm917_vm1, %v914_v2  ;;  %v867_v4 = vld [vmem:[#allocation2 + $0x70] sm:$0xff]  ;;  %v693_v5 = vpop.f32.mrf.mxu2 }
 0x130   : > { %v899_v6 = vpack.c.bf16 %v867_v4, %v867_v4  ;;  %833 = vst.msk [vmem:[#allocation2 + $0x78] sm:$0xff] %vm222_vm0, %v800_v3  ;;  %v782_v8 = vpop.f32.mrf.mxu3 }
 0x131   : > { %v783_v9 = vadd.f32 %v782_v8, %v693_v5 }
 0x132   : > { %932 = vst.msk [vmem:[%s1706_s26 + $0x38] sm:$0xf] %vm917_vm1, %v899_v6 }
 0x133   : > { %v816_v10 = vadd.f32 %v783_v9, %v286_v7 }
 0x134   : > { %v883_v11 = vld [vmem:[#allocation2 + $0xf0] sm:$0xff] }
 0x135   : > { %v915_v12 = vpack.c.bf16 %v883_v11, %v883_v11  ;;  %849 = vst.msk [vmem:[#allocation2 + $0xf8] sm:$0xff] %vm222_vm0, %v816_v10 }
 0x137   : > { %948 = vst.msk [vmem:[%s1706_s26 + $0x78] sm:$0xf] %vm917_vm1, %v915_v12  ;;  %v868_v13 = vld [vmem:[#allocation2 + $0x78] sm:$0xff] }
 0x138   : > { %v900_v14 = vpack.c.bf16 %v868_v13, %v868_v13 }
 0x13a   : > { %933 = vst.msk [vmem:[%s1706_s26 + $0x3c] sm:$0xf] %vm917_vm1, %v900_v14 }
 0x13c   : > { %v884_v15 = vld [vmem:[#allocation2 + $0xf8] sm:$0xff] }
 0x13d   : > { %v916_v16 = vpack.c.bf16 %v884_v15, %v884_v15 }
 0x13f   : > { %949 = vst.msk [vmem:[%s1706_s26 + $0x7c] sm:$0xf] %vm917_vm1, %v916_v16 }
 0x140   : > { %1424 = shalt.err (!%p1421_p5)
}
 0x141   : > { %s1478_s20 = smov 64   ;;  %s1479_s23 = smov 4  }
 0x142   : > { %1339 = dma.vmem_to_hbm [thread:$0]  (%p1535_p4), %s965_s3, 2048, %s967_s4, %s951_s12, %s1478_s20, %s1478_s20, %s1479_s23  }
 0x143 PF: > { %p1345_p6 = scmp.ge.s32.totalorder %s1475_s14, 2  ;;  %s981_s24 = sand.u32 1, %s1455_s9  }
 0x144   : > { %s982_s25 = scalar_lea.sflag [#allocation4], %s981_s24 }
 0x145   : > { %p1342_p7 = pnand %p1345_p6, %p1542_p8 }
 0x147   : > { %p1343_p9 = pneg %p1342_p7 }
 0x149   : > { %1450 = dma.done.wait (%p1343_p9), %s982_s25, 2048  }
 0x14a   : > { %1452 = vsyncadd (%p1343_p9), %s982_s25, 4294965248  ;;  %s15_s14 = sadd.s32 1, %s1475_s14   ;;  %s1845_s9 = smov %s1459_s10 }
 0x14b   : > { %p12_p10 = scmp.ge.s32.totalorder %s15_s14, 4   ;;  %s1846_s10 = smov %s1463_s11 }
 0x14c   : > { %s1847_s11 = smov %s1548_s22  ;;  %s1848_s12 = smov %s1471_s13 }
 0x14d   : > { %s1849_s13 = smov %s1851_s17  ;;  %14 = sbr.rel (!%p12_p10) target bundleno = 4 (0x4), region = 74 }
 0x152   :  { %988 = vsyncpa [#allocation4], 1 }
 0x153   :  { %990 = vsyncpa [#allocation4 + $0x1], 1 }

</bundles_post_ra>
